<compile_context>
chip_gen: v6e
topology: v6e:2x2x1
jax: 0.10.0
libtpu: 0.0.40
codegen_flags: <defaults>
</compile_context>

<pallas_src>
import functools

import jax
import jax.numpy as jnp
from jax.experimental import pallas as pl
from jax.experimental.pallas import tpu as pltpu

_LANES = 128
_NEG_BIG = -1e30  # bias for padded output logits; exp(shifted) underflows to exactly 0


def _round_up(n, m):
    return ((n + m - 1) // m) * m


def _mlp_kernel(x_ref,
                w0_ref, b0_ref,
                w1_ref, b1_ref,
                w2_ref, b2_ref,
                w3_ref, b3_ref,
                w4_ref, b4_ref,
                w5_ref, b5_ref,
                o_ref):
    """Whole forward pass for one batch tile, entirely VMEM-resident.

    x_ref:  (tb, Kp)      bf16
    w*_ref: (in_p, 128)   bf16 (zero-padded)
    b*_ref: (1, 128)      f32  (zero-padded; last layer padded with -1e30)
    o_ref:  (tb, 128)     f32  lane-dense log-probs (first 10 lanes are real)
    """
    def dense_f32(h_bf16, w_ref, b_ref):
        # MXU in bf16, accumulate f32, bias add in f32.
        return jnp.dot(h_bf16, w_ref[...],
                       preferred_element_type=jnp.float32) + b_ref[...]

    h = x_ref[...]  # bf16 (tb, Kp)
    for w_ref, b_ref in ((w0_ref, b0_ref), (w1_ref, b1_ref), (w2_ref, b2_ref),
                         (w3_ref, b3_ref), (w4_ref, b4_ref)):
        z = dense_f32(h, w_ref, b_ref)                 # f32
        h = jax.nn.sigmoid(z).astype(jnp.bfloat16)     # VPU/EUP in f32, cast for MXU

    # Final linear (fc5) + log_softmax over the lane axis.  Padded lanes carry
    # logits of ~-1e30, so max/sum over 128 lanes equal those over the real 10.
    logits = dense_f32(h, w5_ref, b5_ref)              # f32 (tb, 128)
    m = jnp.max(logits, axis=-1, keepdims=True)
    shifted = logits - m
    lse = jnp.log(jnp.sum(jnp.exp(shifted), axis=-1, keepdims=True))
    o_ref[...] = (shifted - lse).astype(o_ref.dtype)


def _pad_params(params, kp):
    """Zero-pad all layers to 128-lane widths; last-layer pad bias = -1e30."""
    n = len(params)
    in_dims = [kp] + [_LANES] * (n - 1)
    padded = []
    for li, (w, b) in enumerate(params):
        fi, fo = w.shape
        pi, po = in_dims[li], _LANES
        wp = jnp.zeros((pi, po), jnp.float32).at[:fi, :fo].set(w.astype(jnp.float32))
        fill = _NEG_BIG if li == n - 1 else 0.0
        bp = jnp.full((1, po), fill, jnp.float32).at[:, :fo].set(
            b.reshape(1, -1).astype(jnp.float32))
        padded.append((wp.astype(jnp.bfloat16), bp))
    return padded


def model_e_forward(x, params, *, image_size, tb=None):
    """x: any shape whose trailing dims multiply to image_size (PyTorch view(-1, image_size))."""
    x2d = x.reshape(-1, image_size).astype(jnp.float32)
    B = x2d.shape[0]

    if tb is None:
        tb = min(256, _round_up(B, 8))   # big tile to amortize per-step overhead / fill MXU
    Bp = _round_up(B, tb)                # pad tail batch instead of asserting divisibility
    Kp = _round_up(image_size, _LANES)   # pad K of the first matmul to full lane tiles

    # Pad / cast inputs and parameters (layout plumbing, outside the kernel).
    x_pad = jnp.zeros((Bp, Kp), jnp.bfloat16).at[:B, :image_size].set(
        x2d.astype(jnp.bfloat16))
    pp = _pad_params(params, Kp)
    (w0, b0), (w1, b1), (w2, b2), (w3, b3), (w4, b4), (w5, b5) = pp

    # x / output tiled over batch; weights & biases are full blocks with constant
    # index maps -> DMA'd once and resident across the whole batch grid.
    x_spec = pl.BlockSpec((tb, Kp), lambda i: (i, 0))
    full = lambda a: pl.BlockSpec(a.shape, lambda i: (0,) * a.ndim)
    in_specs = [x_spec,
                full(w0), full(b0),
                full(w1), full(b1),
                full(w2), full(b2),
                full(w3), full(b3),
                full(w4), full(b4),
                full(w5), full(b5)]
    out_spec = pl.BlockSpec((tb, _LANES), lambda i: (i, 0))  # lane-dense output slab

    out_pad = pl.pallas_call(
        _mlp_kernel,
        out_shape=jax.ShapeDtypeStruct((Bp, _LANES), jnp.float32),
        grid_spec=pltpu.PrefetchScalarGridSpec(
            num_scalar_prefetch=0,
            grid=(Bp // tb,),
            in_specs=in_specs,
            out_specs=out_spec,
        ),
        compiler_params=pltpu.CompilerParams(
            dimension_semantics=("parallel",)),
    )(x_pad, w0, b0, w1, b1, w2, b2, w3, b3, w4, b4, w5, b5)

    return out_pad[:B, :10]


def init_params(key, image_size):
    """Deterministic param init; layer sizes from ModelE.__init__ (W stored (in, out))."""
    sizes = [(image_size, 128), (128, 64), (64, 10), (10, 10), (10, 10), (10, 10)]
    params = []
    for (fan_in, fan_out) in sizes:
        key, kw, kb = jax.random.split(key, 3)
        bound = 1.0 / jnp.sqrt(fan_in)
        w = jax.random.uniform(kw, (fan_in, fan_out), jnp.float32, -bound, bound)
        b = jax.random.uniform(kb, (1, fan_out), jnp.float32, -bound, bound)
        params.append((w, b))
    return params


def _reference(x, params, image_size):
    """Pure-JAX reference replicating the kernel's bf16-MXU / f32-activation pipeline."""
    h32 = x.reshape(-1, image_size).astype(jnp.float32)
    hb = h32.astype(jnp.bfloat16)
    z = None
    for i, (w, b) in enumerate(params):
        z = jnp.dot(hb, w.astype(jnp.bfloat16),
                    preferred_element_type=jnp.float32) + b.astype(jnp.float32)
        if i < len(params) - 1:
            hb = jax.nn.sigmoid(z).astype(jnp.bfloat16)
    return jax.nn.log_softmax(z, axis=1)


if __name__ == "__main__":
    image_size = 16 * 16          # flattened 16x16 single-channel images
    B = 16                        # small demo batch

    key = jax.random.PRNGKey(0)
    key, kx = jax.random.split(key)
    x = jax.random.normal(kx, (B, 16, 16), jnp.float32)  # forward flattens via view(-1, image_size)

    params = init_params(key, image_size)

    fwd = jax.jit(functools.partial(model_e_forward, image_size=image_size))
    out = jax.block_until_ready(fwd(x, params))

    ref = _reference(x, params, image_size)
    assert out.shape == (B, 10), out.shape
    assert bool(jnp.allclose(out, ref, atol=1e-4, rtol=1e-4)), \
        float(jnp.max(jnp.abs(out - ref)))

    print("KERNEL_OK")
</pallas_src>

<mosaic_0001>
module attributes {stable_mosaic.version = 11 : i64} {
  func.func @_mlp_kernel(%arg0: i32, %arg1: memref<16x256xbf16, #tpu.memory_space<vmem>>, %arg2: memref<256x128xbf16, #tpu.memory_space<vmem>>, %arg3: memref<1x128xf32, #tpu.memory_space<vmem>>, %arg4: memref<128x128xbf16, #tpu.memory_space<vmem>>, %arg5: memref<1x128xf32, #tpu.memory_space<vmem>>, %arg6: memref<128x128xbf16, #tpu.memory_space<vmem>>, %arg7: memref<1x128xf32, #tpu.memory_space<vmem>>, %arg8: memref<128x128xbf16, #tpu.memory_space<vmem>>, %arg9: memref<1x128xf32, #tpu.memory_space<vmem>>, %arg10: memref<128x128xbf16, #tpu.memory_space<vmem>>, %arg11: memref<1x128xf32, #tpu.memory_space<vmem>>, %arg12: memref<128x128xbf16, #tpu.memory_space<vmem>>, %arg13: memref<1x128xf32, #tpu.memory_space<vmem>>, %arg14: memref<16x128xf32, #tpu.memory_space<vmem>>) attributes {dimension_semantics = [#tpu.dimension_semantics<parallel>], iteration_bounds = array<i64: 1>, scalar_prefetch = 0 : i64, scratch_operands = 0 : i64, tpu.core_type = #tpu.core_type<tc>, window_params = [{transform_indices = @transform_0, window_bounds = array<i64: 16, 256>}, {pipeline_mode = #tpu.pipeline_mode<synchronous>, transform_indices = @transform_1, window_bounds = array<i64: 256, 128>}, {pipeline_mode = #tpu.pipeline_mode<synchronous>, transform_indices = @transform_2, window_bounds = array<i64: 1, 128>}, {pipeline_mode = #tpu.pipeline_mode<synchronous>, transform_indices = @transform_3, window_bounds = array<i64: 128, 128>}, {pipeline_mode = #tpu.pipeline_mode<synchronous>, transform_indices = @transform_4, window_bounds = array<i64: 1, 128>}, {pipeline_mode = #tpu.pipeline_mode<synchronous>, transform_indices = @transform_5, window_bounds = array<i64: 128, 128>}, {pipeline_mode = #tpu.pipeline_mode<synchronous>, transform_indices = @transform_6, window_bounds = array<i64: 1, 128>}, {pipeline_mode = #tpu.pipeline_mode<synchronous>, transform_indices = @transform_7, window_bounds = array<i64: 128, 128>}, {pipeline_mode = #tpu.pipeline_mode<synchronous>, transform_indices = @transform_8, window_bounds = array<i64: 1, 128>}, {pipeline_mode = #tpu.pipeline_mode<synchronous>, transform_indices = @transform_9, window_bounds = array<i64: 128, 128>}, {pipeline_mode = #tpu.pipeline_mode<synchronous>, transform_indices = @transform_10, window_bounds = array<i64: 1, 128>}, {pipeline_mode = #tpu.pipeline_mode<synchronous>, transform_indices = @transform_11, window_bounds = array<i64: 128, 128>}, {pipeline_mode = #tpu.pipeline_mode<synchronous>, transform_indices = @transform_12, window_bounds = array<i64: 1, 128>}, {transform_indices = @transform_13, window_bounds = array<i64: 16, 128>}]} {
    %c0 = arith.constant 0 : index
    %c0_0 = arith.constant 0 : index
    %0 = vector.load %arg1[%c0, %c0_0] : memref<16x256xbf16, #tpu.memory_space<vmem>>, vector<16x256xbf16>
    %c0_1 = arith.constant 0 : index
    %c0_2 = arith.constant 0 : index
    %1 = vector.load %arg2[%c0_1, %c0_2] : memref<256x128xbf16, #tpu.memory_space<vmem>>, vector<256x128xbf16>
    %cst = arith.constant dense<0.000000e+00> : vector<16x128xf32>
    %2 = tpu.matmul %0, %1, %cst {dimension_numbers = #tpu.dot_dimension_numbers<[1], [0], [0], [1], [0, 0, 1, 1], [], []>} : vector<16x256xbf16>, vector<256x128xbf16>, vector<16x128xf32> -> vector<16x128xf32>
    %c0_3 = arith.constant 0 : index
    %c0_4 = arith.constant 0 : index
    %3 = vector.load %arg3[%c0_3, %c0_4] : memref<1x128xf32, #tpu.memory_space<vmem>>, vector<1x128xf32>
    %4 = vector.broadcast %3 : vector<1x128xf32> to vector<16x128xf32>
    %5 = arith.addf %2, %4 : vector<16x128xf32>
    %6 = arith.negf %5 : vector<16x128xf32>
    %7 = math.exp %6 : vector<16x128xf32>
    %cst_5 = arith.constant 1.000000e+00 : f32
    %8 = vector.broadcast %cst_5 : f32 to vector<16x128xf32>
    %9 = arith.addf %8, %7 : vector<16x128xf32>
    %10 = arith.divf %8, %9 : vector<16x128xf32>
    %11 = arith.truncf %10 : vector<16x128xf32> to vector<16x128xbf16>
    %c0_6 = arith.constant 0 : index
    %c0_7 = arith.constant 0 : index
    %12 = vector.load %arg4[%c0_6, %c0_7] : memref<128x128xbf16, #tpu.memory_space<vmem>>, vector<128x128xbf16>
    %cst_8 = arith.constant dense<0.000000e+00> : vector<16x128xf32>
    %13 = tpu.matmul %11, %12, %cst_8 {dimension_numbers = #tpu.dot_dimension_numbers<[1], [0], [0], [1], [0, 0, 1, 1], [], []>} : vector<16x128xbf16>, vector<128x128xbf16>, vector<16x128xf32> -> vector<16x128xf32>
    %c0_9 = arith.constant 0 : index
    %c0_10 = arith.constant 0 : index
    %14 = vector.load %arg5[%c0_9, %c0_10] : memref<1x128xf32, #tpu.memory_space<vmem>>, vector<1x128xf32>
    %15 = vector.broadcast %14 : vector<1x128xf32> to vector<16x128xf32>
    %16 = arith.addf %13, %15 : vector<16x128xf32>
    %17 = arith.negf %16 : vector<16x128xf32>
    %18 = math.exp %17 : vector<16x128xf32>
    %cst_11 = arith.constant 1.000000e+00 : f32
    %19 = vector.broadcast %cst_11 : f32 to vector<16x128xf32>
    %20 = arith.addf %19, %18 : vector<16x128xf32>
    %21 = arith.divf %19, %20 : vector<16x128xf32>
    %22 = arith.truncf %21 : vector<16x128xf32> to vector<16x128xbf16>
    %c0_12 = arith.constant 0 : index
    %c0_13 = arith.constant 0 : index
    %23 = vector.load %arg6[%c0_12, %c0_13] : memref<128x128xbf16, #tpu.memory_space<vmem>>, vector<128x128xbf16>
    %cst_14 = arith.constant dense<0.000000e+00> : vector<16x128xf32>
    %24 = tpu.matmul %22, %23, %cst_14 {dimension_numbers = #tpu.dot_dimension_numbers<[1], [0], [0], [1], [0, 0, 1, 1], [], []>} : vector<16x128xbf16>, vector<128x128xbf16>, vector<16x128xf32> -> vector<16x128xf32>
    %c0_15 = arith.constant 0 : index
    %c0_16 = arith.constant 0 : index
    %25 = vector.load %arg7[%c0_15, %c0_16] : memref<1x128xf32, #tpu.memory_space<vmem>>, vector<1x128xf32>
    %26 = vector.broadcast %25 : vector<1x128xf32> to vector<16x128xf32>
    %27 = arith.addf %24, %26 : vector<16x128xf32>
    %28 = arith.negf %27 : vector<16x128xf32>
    %29 = math.exp %28 : vector<16x128xf32>
    %cst_17 = arith.constant 1.000000e+00 : f32
    %30 = vector.broadcast %cst_17 : f32 to vector<16x128xf32>
    %31 = arith.addf %30, %29 : vector<16x128xf32>
    %32 = arith.divf %30, %31 : vector<16x128xf32>
    %33 = arith.truncf %32 : vector<16x128xf32> to vector<16x128xbf16>
    %c0_18 = arith.constant 0 : index
    %c0_19 = arith.constant 0 : index
    %34 = vector.load %arg8[%c0_18, %c0_19] : memref<128x128xbf16, #tpu.memory_space<vmem>>, vector<128x128xbf16>
    %cst_20 = arith.constant dense<0.000000e+00> : vector<16x128xf32>
    %35 = tpu.matmul %33, %34, %cst_20 {dimension_numbers = #tpu.dot_dimension_numbers<[1], [0], [0], [1], [0, 0, 1, 1], [], []>} : vector<16x128xbf16>, vector<128x128xbf16>, vector<16x128xf32> -> vector<16x128xf32>
    %c0_21 = arith.constant 0 : index
    %c0_22 = arith.constant 0 : index
    %36 = vector.load %arg9[%c0_21, %c0_22] : memref<1x128xf32, #tpu.memory_space<vmem>>, vector<1x128xf32>
    %37 = vector.broadcast %36 : vector<1x128xf32> to vector<16x128xf32>
    %38 = arith.addf %35, %37 : vector<16x128xf32>
    %39 = arith.negf %38 : vector<16x128xf32>
    %40 = math.exp %39 : vector<16x128xf32>
    %cst_23 = arith.constant 1.000000e+00 : f32
    %41 = vector.broadcast %cst_23 : f32 to vector<16x128xf32>
    %42 = arith.addf %41, %40 : vector<16x128xf32>
    %43 = arith.divf %41, %42 : vector<16x128xf32>
    %44 = arith.truncf %43 : vector<16x128xf32> to vector<16x128xbf16>
    %c0_24 = arith.constant 0 : index
    %c0_25 = arith.constant 0 : index
    %45 = vector.load %arg10[%c0_24, %c0_25] : memref<128x128xbf16, #tpu.memory_space<vmem>>, vector<128x128xbf16>
    %cst_26 = arith.constant dense<0.000000e+00> : vector<16x128xf32>
    %46 = tpu.matmul %44, %45, %cst_26 {dimension_numbers = #tpu.dot_dimension_numbers<[1], [0], [0], [1], [0, 0, 1, 1], [], []>} : vector<16x128xbf16>, vector<128x128xbf16>, vector<16x128xf32> -> vector<16x128xf32>
    %c0_27 = arith.constant 0 : index
    %c0_28 = arith.constant 0 : index
    %47 = vector.load %arg11[%c0_27, %c0_28] : memref<1x128xf32, #tpu.memory_space<vmem>>, vector<1x128xf32>
    %48 = vector.broadcast %47 : vector<1x128xf32> to vector<16x128xf32>
    %49 = arith.addf %46, %48 : vector<16x128xf32>
    %50 = arith.negf %49 : vector<16x128xf32>
    %51 = math.exp %50 : vector<16x128xf32>
    %cst_29 = arith.constant 1.000000e+00 : f32
    %52 = vector.broadcast %cst_29 : f32 to vector<16x128xf32>
    %53 = arith.addf %52, %51 : vector<16x128xf32>
    %54 = arith.divf %52, %53 : vector<16x128xf32>
    %55 = arith.truncf %54 : vector<16x128xf32> to vector<16x128xbf16>
    %c0_30 = arith.constant 0 : index
    %c0_31 = arith.constant 0 : index
    %56 = vector.load %arg12[%c0_30, %c0_31] : memref<128x128xbf16, #tpu.memory_space<vmem>>, vector<128x128xbf16>
    %cst_32 = arith.constant dense<0.000000e+00> : vector<16x128xf32>
    %57 = tpu.matmul %55, %56, %cst_32 {dimension_numbers = #tpu.dot_dimension_numbers<[1], [0], [0], [1], [0, 0, 1, 1], [], []>} : vector<16x128xbf16>, vector<128x128xbf16>, vector<16x128xf32> -> vector<16x128xf32>
    %c0_33 = arith.constant 0 : index
    %c0_34 = arith.constant 0 : index
    %58 = vector.load %arg13[%c0_33, %c0_34] : memref<1x128xf32, #tpu.memory_space<vmem>>, vector<1x128xf32>
    %59 = vector.broadcast %58 : vector<1x128xf32> to vector<16x128xf32>
    %60 = arith.addf %57, %59 : vector<16x128xf32>
    %cst_35 = arith.constant dense<0xFF800000> : vector<16xf32>
    %61 = vector.multi_reduction <maximumf>, %60, %cst_35 [1] : vector<16x128xf32> to vector<16xf32>
    %62 = vector.shape_cast %61 : vector<16xf32> to vector<16x1xf32>
    %63 = vector.broadcast %62 : vector<16x1xf32> to vector<16x128xf32>
    %64 = arith.subf %60, %63 : vector<16x128xf32>
    %65 = math.exp %64 : vector<16x128xf32>
    %cst_36 = arith.constant dense<0.000000e+00> : vector<16xf32>
    %66 = vector.multi_reduction <add>, %65, %cst_36 [1] : vector<16x128xf32> to vector<16xf32>
    %67 = vector.shape_cast %66 : vector<16xf32> to vector<16x1xf32>
    %68 = math.log %67 : vector<16x1xf32>
    %69 = vector.broadcast %68 : vector<16x1xf32> to vector<16x128xf32>
    %70 = arith.subf %64, %69 : vector<16x128xf32>
    %c0_37 = arith.constant 0 : index
    %c0_38 = arith.constant 0 : index
    %71 = vector.load %arg14[%c0_37, %c0_38] : memref<16x128xf32, #tpu.memory_space<vmem>>, vector<16x128xf32>
    tpu.vector_store %arg14[%c0_37, %c0_38], %70 {strides = array<i32>} : memref<16x128xf32, #tpu.memory_space<vmem>>, vector<16x128xf32>,
    return
  }
  func.func @transform_0(%arg0: i32) -> (i32, i32) {
    %c0_i32 = arith.constant 0 : i32
    %c0_i32_0 = arith.constant 0 : i32
    return %arg0, %c0_i32 : i32, i32
  }
  func.func @transform_1(%arg0: i32) -> (i32, i32) {
    %c0_i32 = arith.constant 0 : i32
    %c0_i32_0 = arith.constant 0 : i32
    %c0_i32_1 = arith.constant 0 : i32
    return %c0_i32, %c0_i32_0 : i32, i32
  }
  func.func @transform_2(%arg0: i32) -> (i32, i32) {
    %c0_i32 = arith.constant 0 : i32
    %c0_i32_0 = arith.constant 0 : i32
    %c0_i32_1 = arith.constant 0 : i32
    return %c0_i32, %c0_i32_0 : i32, i32
  }
  func.func @transform_3(%arg0: i32) -> (i32, i32) {
    %c0_i32 = arith.constant 0 : i32
    %c0_i32_0 = arith.constant 0 : i32
    %c0_i32_1 = arith.constant 0 : i32
    return %c0_i32, %c0_i32_0 : i32, i32
  }
  func.func @transform_4(%arg0: i32) -> (i32, i32) {
    %c0_i32 = arith.constant 0 : i32
    %c0_i32_0 = arith.constant 0 : i32
    %c0_i32_1 = arith.constant 0 : i32
    return %c0_i32, %c0_i32_0 : i32, i32
  }
  func.func @transform_5(%arg0: i32) -> (i32, i32) {
    %c0_i32 = arith.constant 0 : i32
    %c0_i32_0 = arith.constant 0 : i32
    %c0_i32_1 = arith.constant 0 : i32
    return %c0_i32, %c0_i32_0 : i32, i32
  }
  func.func @transform_6(%arg0: i32) -> (i32, i32) {
    %c0_i32 = arith.constant 0 : i32
    %c0_i32_0 = arith.constant 0 : i32
    %c0_i32_1 = arith.constant 0 : i32
    return %c0_i32, %c0_i32_0 : i32, i32
  }
  func.func @transform_7(%arg0: i32) -> (i32, i32) {
    %c0_i32 = arith.constant 0 : i32
    %c0_i32_0 = arith.constant 0 : i32
    %c0_i32_1 = arith.constant 0 : i32
    return %c0_i32, %c0_i32_0 : i32, i32
  }
  func.func @transform_8(%arg0: i32) -> (i32, i32) {
    %c0_i32 = arith.constant 0 : i32
    %c0_i32_0 = arith.constant 0 : i32
    %c0_i32_1 = arith.constant 0 : i32
    return %c0_i32, %c0_i32_0 : i32, i32
  }
  func.func @transform_9(%arg0: i32) -> (i32, i32) {
    %c0_i32 = arith.constant 0 : i32
    %c0_i32_0 = arith.constant 0 : i32
    %c0_i32_1 = arith.constant 0 : i32
    return %c0_i32, %c0_i32_0 : i32, i32
  }
  func.func @transform_10(%arg0: i32) -> (i32, i32) {
    %c0_i32 = arith.constant 0 : i32
    %c0_i32_0 = arith.constant 0 : i32
    %c0_i32_1 = arith.constant 0 : i32
    return %c0_i32, %c0_i32_0 : i32, i32
  }
  func.func @transform_11(%arg0: i32) -> (i32, i32) {
    %c0_i32 = arith.constant 0 : i32
    %c0_i32_0 = arith.constant 0 : i32
    %c0_i32_1 = arith.constant 0 : i32
    return %c0_i32, %c0_i32_0 : i32, i32
  }
  func.func @transform_12(%arg0: i32) -> (i32, i32) {
    %c0_i32 = arith.constant 0 : i32
    %c0_i32_0 = arith.constant 0 : i32
    %c0_i32_1 = arith.constant 0 : i32
    return %c0_i32, %c0_i32_0 : i32, i32
  }
  func.func @transform_13(%arg0: i32) -> (i32, i32) {
    %c0_i32 = arith.constant 0 : i32
    %c0_i32_0 = arith.constant 0 : i32
    return %arg0, %c0_i32 : i32, i32
  }
}

</mosaic_0001>

<bundles_post_ra>
// kernel: model_e_forward.1
= control target key start
LH: loop header
LB: loop body
LE: loop exit
PB: predicated region body
PF: predicated region fallthrough
CT: control target
= control target key end

     0   :  { %s1592_s0 = inlined_call_operand.vmem [shape: bf16[16,256], index: 0, kind: input, shape index: {}]   ;;  %s1593_s1 = inlined_call_operand.vmem [shape: bf16[256,128], index: 1, kind: input, shape index: {}]   ;;  %s1594_s2 = inlined_call_operand.vmem [shape: f32[1,128], index: 2, kind: input, shape index: {}]   ;;  %s1595_s3 = inlined_call_operand.vmem [shape: bf16[128,128], index: 3, kind: input, shape index: {}]   ;;  %s1596_s4 = inlined_call_operand.vmem [shape: f32[1,128], index: 4, kind: input, shape index: {}]   ;;  %s1597_s5 = inlined_call_operand.vmem [shape: bf16[128,128], index: 5, kind: input, shape index: {}]   ;;  %s1598_s6 = inlined_call_operand.vmem [shape: f32[1,128], index: 6, kind: input, shape index: {}]   ;;  %s1599_s7 = inlined_call_operand.vmem [shape: bf16[128,128], index: 7, kind: input, shape index: {}]   ;;  %s1600_s8 = inlined_call_operand.vmem [shape: f32[1,128], index: 8, kind: input, shape index: {}]   ;;  %s1601_s9 = inlined_call_operand.vmem [shape: bf16[128,128], index: 9, kind: input, shape index: {}]   ;;  %s1602_s10 = inlined_call_operand.vmem [shape: f32[1,128], index: 10, kind: input, shape index: {}]   ;;  %s1603_s11 = inlined_call_operand.vmem [shape: bf16[128,128], index: 11, kind: input, shape index: {}]   ;;  %s1604_s12 = inlined_call_operand.vmem [shape: f32[1,128], index: 12, kind: input, shape index: {}]   ;;  %s1605_s13 = inlined_call_operand.hbm [shape: f32[16,128], index: 13, kind: output, shape index: {}]  }
   0x1   :  { %v1143_v0 = vld [vmem:[%s1593_s1 + $0x78] sm:$0xff]   ;;  %v1145_v2 = vld [vmem:[%s1593_s1 + $0x70] sm:$0xff]   ;;  %v1147_v4 = vld [vmem:[%s1593_s1 + $0x68] sm:$0xff]  }
   0x2   :  { %v1144_v1 = vld [vmem:[%s1593_s1 + $0x38] sm:$0xff]   ;;  %971 = vmatprep.subr.bf16.mxu0 %v1143_v0  ;;  %v1146_v3 = vld [vmem:[%s1593_s1 + $0x30] sm:$0xff]   ;;  %v1148_v5 = vld [vmem:[%s1593_s1 + $0x28] sm:$0xff]  }
   0x3   :  { %972 = vmatpush3.bf16.msra.mxu0 %v1144_v1  ;;  %v1149_v6 = vld [vmem:[%s1593_s1 + $0x60] sm:$0xff]   ;;  %v1151_v8 = vld [vmem:[%s1593_s1 + $0x58] sm:$0xff]   ;;  %v1153_v10 = vld [vmem:[%s1593_s1 + $0x50] sm:$0xff]  }
   0x4   :  { %973 = vmatprep.subr.bf16.mxu0 %v1145_v2  ;;  %v1150_v7 = vld [vmem:[%s1593_s1 + $0x20] sm:$0xff]   ;;  %v1152_v9 = vld [vmem:[%s1593_s1 + $0x18] sm:$0xff]   ;;  %v1154_v11 = vld [vmem:[%s1593_s1 + $0x10] sm:$0xff]  }
   0x5   :  { %v1161_v12 = vld [vmem:[%s1592_s0 + $0x4] ss:$8 sps:$4 sm:$0xff]   ;;  %v1159_v17 = vld [vmem:[%s1592_s0] ss:$8 sps:$4 sm:$0xff]  }
   0x6   :  { %v1155_v13 = vld [vmem:[%s1593_s1 + $0x48] sm:$0xff]   ;;  %225 = vmatprep.mubr.bf16.mxu0 %v1161_v12  ;;  %v1157_v15 = vld [vmem:[%s1593_s1 + $0x40] sm:$0xff]  }
   0x7   :  { %974 = vmatpush3.bf16.msra.mxu0 %v1146_v3  ;;  %v1156_v14 = vld [vmem:[%s1593_s1 + $0x8] sm:$0xff]   ;;  %v1158_v16 = vld [vmem:[%s1593_s1] sm:$0xff]  }
   0x8   :  { %975 = vmatprep.subr.bf16.mxu0 %v1147_v4 }
   0xb   :  { %976 = vmatpush3.bf16.msra.mxu0 %v1148_v5 }
   0xc   :  { %977 = vmatprep.subr.bf16.mxu0 %v1149_v6 }
   0xf   :  { %978 = vmatpush3.bf16.msra.mxu0 %v1150_v7 }
  0x10   :  { %979 = vmatprep.subr.bf16.mxu0 %v1151_v8 }
  0x13   :  { %980 = vmatpush3.bf16.msra.mxu0 %v1152_v9 }
  0x14   :  { %981 = vmatprep.subr.bf16.mxu0 %v1153_v10 }
  0x17   :  { %982 = vmatpush3.bf16.msra.mxu0 %v1154_v11 }
  0x18   :  { %983 = vmatprep.subr.bf16.mxu0 %v1155_v13 }
  0x1b   :  { %984 = vmatpush3.bf16.msra.mxu0 %v1156_v14 }
  0x1c   :  { %985 = vmatprep.subr.bf16.mxu0 %v1157_v15 }
  0x1f   :  { %986 = vmatpush3.bf16.msra.mxu0 %v1158_v16 }
  0x22   :  { %226 = vmatmul.mubr.bf16.vlgmr.msra.gmra.mxu0 %v1159_v17 }
  0x23   :  { %18 = vsyncpa [#allocation3], 0  ;;  %v1162_v18 = vld [vmem:[%s1595_s3 + $0x38] sm:$0xff]   ;;  %v1272_v19 = vmov 0.0   ;;  %v1163_v20 = vld [vmem:[%s1595_s3 + $0x30] sm:$0xff]   ;;  %vm1273_vm0 = vmmov 0  }
  0x24   :  { %1038 = vmatprep.subr.bf16.mxu1 %v1272_v19  ;;  %1058 = vmatprep.subr.bf16.mxu0 %v1272_v19  ;;  %v1164_v21 = vld [vmem:[%s1595_s3 + $0x28] sm:$0xff]   ;;  %v1165_v22 = vld [vmem:[%s1595_s3 + $0x20] sm:$0xff]   ;;  %v1166_v23 = vld [vmem:[%s1595_s3 + $0x18] sm:$0xff]  }
  0x25   :  { %1039 = vmatpush3.bf16.msra.mxu1 %v1162_v18  ;;  %v1167_v24 = vld [vmem:[%s1595_s3 + $0x10] sm:$0xff]   ;;  %1054 = vmatprep.mubr.msk.bf16.mxu1 %vm1273_vm0, %v1272_v19  ;;  %v1168_v25 = vld [vmem:[%s1595_s3 + $0x8] sm:$0xff]   ;;  %v1169_v26 = vld [vmem:[%s1595_s3] sm:$0xff]  }
  0x26   :  { %1040 = vmatprep.subr.bf16.mxu1 %v1272_v19  ;;  %1074 = vmatprep.mubr.msk.bf16.mxu0 %vm1273_vm0, %v1272_v19  ;;  %v897_v28 = vld [vmem:[%s1594_s2] ss:$0 sm:$0xff]  ;;  %v1170_v45 = vld [vmem:[%s1597_s5 + $0x38] sm:$0xff]   ;;  %v1171_v46 = vld [vmem:[%s1597_s5 + $0x30] sm:$0xff]  }
  0x27   :  { %1059 = vmatpush3.bf16.msra.mxu0 %v1170_v45  ;;  %v1172_v47 = vld [vmem:[%s1597_s5 + $0x28] sm:$0xff]   ;;  %v1173_v48 = vld [vmem:[%s1597_s5 + $0x20] sm:$0xff]   ;;  %v1174_v49 = vld [vmem:[%s1597_s5 + $0x18] sm:$0xff]  }
  0x28   :  { %1060 = vmatprep.subr.bf16.mxu0 %v1272_v19  ;;  %v1175_v50 = vld [vmem:[%s1597_s5 + $0x10] sm:$0xff]   ;;  %v1176_v51 = vld [vmem:[%s1597_s5 + $0x8] sm:$0xff]   ;;  %v1177_v52 = vld [vmem:[%s1597_s5] sm:$0xff]  }
  0x29   :  { %1041 = vmatpush3.bf16.msra.mxu1 %v1163_v20  ;;  %v918_v53 = vld [vmem:[%s1596_s4] ss:$0 sm:$0xff]  ;;  %v1178_v5 = vld [vmem:[%s1599_s7 + $0x38] sm:$0xff]   ;;  %v1179_v6 = vld [vmem:[%s1599_s7 + $0x30] sm:$0xff]  }
  0x2a   :  { %1042 = vmatprep.subr.bf16.mxu1 %v1272_v19  ;;  %v1180_v7 = vld [vmem:[%s1599_s7 + $0x28] sm:$0xff]   ;;  %v1181_v8 = vld [vmem:[%s1599_s7 + $0x20] sm:$0xff]   ;;  %v1182_v9 = vld [vmem:[%s1599_s7 + $0x18] sm:$0xff]  }
  0x2b   :  { %1061 = vmatpush3.bf16.msra.mxu0 %v1171_v46  ;;  %v1183_v10 = vld [vmem:[%s1599_s7 + $0x10] sm:$0xff]   ;;  %v1184_v11 = vld [vmem:[%s1599_s7 + $0x8] sm:$0xff]   ;;  %v1185_v12 = vld [vmem:[%s1599_s7] sm:$0xff]  }
  0x2c   :  { %1062 = vmatprep.subr.bf16.mxu0 %v1272_v19  ;;  %v929_v13 = vld [vmem:[%s1598_s6] ss:$0 sm:$0xff] }
  0x2d   :  { %1043 = vmatpush3.bf16.msra.mxu1 %v1164_v21 }
  0x2e   :  { %1044 = vmatprep.subr.bf16.mxu1 %v1272_v19 }
  0x2f   :  { %1063 = vmatpush3.bf16.msra.mxu0 %v1172_v47 }
  0x30   :  { %1064 = vmatprep.subr.bf16.mxu0 %v1272_v19 }
  0x31   :  { %1045 = vmatpush3.bf16.msra.mxu1 %v1165_v22 }
  0x32   :  { %1046 = vmatprep.subr.bf16.mxu1 %v1272_v19 }
  0x33   :  { %1065 = vmatpush3.bf16.msra.mxu0 %v1173_v48 }
  0x34   :  { %1066 = vmatprep.subr.bf16.mxu0 %v1272_v19 }
  0x35   :  { %1047 = vmatpush3.bf16.msra.mxu1 %v1166_v23 }
  0x36   :  { %1048 = vmatprep.subr.bf16.mxu1 %v1272_v19 }
  0x37   :  { %1067 = vmatpush3.bf16.msra.mxu0 %v1174_v49 }
  0x38   :  { %1068 = vmatprep.subr.bf16.mxu0 %v1272_v19 }
  0x39   :  { %1049 = vmatpush3.bf16.msra.mxu1 %v1167_v24 }
  0x3a   :  { %1050 = vmatprep.subr.bf16.mxu1 %v1272_v19 }
  0x3b   :  { %1069 = vmatpush3.bf16.msra.mxu0 %v1175_v50 }
  0x3c   :  { %1070 = vmatprep.subr.bf16.mxu0 %v1272_v19 }
  0x3d   :  { %1051 = vmatpush3.bf16.msra.mxu1 %v1168_v25 }
  0x3e   :  { %1052 = vmatprep.subr.bf16.mxu1 %v1272_v19 }
  0x3f   :  { %1071 = vmatpush3.bf16.msra.mxu0 %v1176_v51 }
  0x40   :  { %1072 = vmatprep.subr.bf16.mxu0 %v1272_v19 }
  0x41   :  { %1053 = vmatpush3.bf16.msra.mxu1 %v1169_v26 }
  0x42   :  { %1078 = vmatprep.subr.bf16.mxu1 %v1272_v19 }
  0x43   :  { %1073 = vmatpush3.bf16.msra.mxu0 %v1177_v52 }
  0x44   :  { %1098 = vmatprep.subr.bf16.mxu0 %v1272_v19 }
  0xe2   :  { %v987_v27 = vpop.f32.mrf.mxu0 }
  0xe4   :  { %v988_v29 = vpop.f32.mrf.mxu0 }
  0xe5   :  { %v989_v30 = vadd.f32 %v988_v29, %v987_v27 }
  0xe6   :  { %v990_v31 = vpop.f32.mrf.mxu0 }
  0xe7   :  { %v228_v32 = vadd.f32 %v989_v30, %v897_v28  ;;  %v1186_v30 = vld [vmem:[%s1601_s9 + $0x38] sm:$0xff]  }
  0xe8   :  { %v991_v33 = vpop.f32.mrf.mxu0 }
  0xe9   :  { %v916_v34 = vmul.f32 -1.442695, %v228_v32  ;;  %v992_v35 = vadd.f32 %v991_v33, %v990_v31  ;;  %v1187_v31 = vld [vmem:[%s1601_s9 + $0x30] sm:$0xff]   ;;  %v1188_v32 = vld [vmem:[%s1601_s9 + $0x28] sm:$0xff]   ;;  %v1189_v33 = vld [vmem:[%s1601_s9 + $0x20] sm:$0xff]  }
  0xeb   :  { %1202 = vpow2.f32 %v916_v34  ;;  %v231_v36 = vadd.f32 %v992_v35, %v897_v28  ;;  %v1190_v34 = vld [vmem:[%s1601_s9 + $0x18] sm:$0xff]   ;;  %v1191_v35 = vld [vmem:[%s1601_s9 + $0x10] sm:$0xff]  }
  0xed   :  { %v917_v37 = vmul.f32 -1.442695, %v231_v36  ;;  %v1192_v36 = vld [vmem:[%s1601_s9 + $0x8] sm:$0xff]  }
  0xef   :  { %1204 = vpow2.f32 %v917_v37  ;;  %v1193_v37 = vld [vmem:[%s1601_s9] sm:$0xff]  }
  0xf8   :  { %v1203_v38 = vpop.eup %1202 }
  0xf9   :  { %v240_v39 = vadd.f32 1.0, %v1203_v38  ;;  %v940_v38 = vld [vmem:[%s1600_s8] ss:$0 sm:$0xff] }
  0xfb   :  { %1206 = vrcp.f32 %v240_v39 }
  0xfc   :  { %v1205_v40 = vpop.eup %1204 }
  0xfd   :  { %v241_v41 = vadd.f32 1.0, %v1205_v40 }
  0xff   :  { %1208 = vrcp.f32 %v241_v41 }
 0x108   :  { %v1207_v42 = vpop.eup %1206 }
 0x10c   :  { %v1209_v43 = vpop.eup %1208 }
 0x10d   :  { %v246_v44 = vpack.c.bf16 %v1209_v43, %v1207_v42 }
 0x10f   :  { %1055 = vmatmul.mubr.bf16.vlgmr.msra.gmra.mxu1 %v246_v44 }
 0x110   :  { %1094 = vmatprep.mubr.msk.bf16.mxu1 %vm1273_vm0, %v1272_v19  ;;  %1079 = vmatpush3.bf16.msra.mxu1 %v1178_v5 }
 0x111   :  { %1080 = vmatprep.subr.bf16.mxu1 %v1272_v19 }
 0x114   :  { %1081 = vmatpush3.bf16.msra.mxu1 %v1179_v6 }
 0x115   :  { %1082 = vmatprep.subr.bf16.mxu1 %v1272_v19 }
 0x118   :  { %1083 = vmatpush3.bf16.msra.mxu1 %v1180_v7 }
 0x119   :  { %1084 = vmatprep.subr.bf16.mxu1 %v1272_v19 }
 0x11c   :  { %1085 = vmatpush3.bf16.msra.mxu1 %v1181_v8 }
 0x11d   :  { %1086 = vmatprep.subr.bf16.mxu1 %v1272_v19 }
 0x120   :  { %1087 = vmatpush3.bf16.msra.mxu1 %v1182_v9 }
 0x121   :  { %1088 = vmatprep.subr.bf16.mxu1 %v1272_v19 }
 0x124   :  { %1089 = vmatpush3.bf16.msra.mxu1 %v1183_v10 }
 0x125   :  { %1090 = vmatprep.subr.bf16.mxu1 %v1272_v19 }
 0x128   :  { %1091 = vmatpush3.bf16.msra.mxu1 %v1184_v11 }
 0x129   :  { %1092 = vmatprep.subr.bf16.mxu1 %v1272_v19 }
 0x12c   :  { %1093 = vmatpush3.bf16.msra.mxu1 %v1185_v12 }
 0x12d   :  { %1118 = vmatprep.subr.bf16.mxu1 %v1272_v19 }
 0x1cf   :  { %v352_v54 = vpop.f32.mrf.mxu1 }
 0x1d0   :  { %v353_v55 = vadd.f32 %v918_v53, %v352_v54  ;;  %v1194_v54 = vld [vmem:[%s1603_s11 + $0x38] sm:$0xff]  }
 0x1d1   :  { %v1056_v56 = vpop.f32.mrf.mxu1 }
 0x1d2   :  { %v927_v57 = vmul.f32 -1.442695, %v353_v55  ;;  %v1195_v55 = vld [vmem:[%s1603_s11 + $0x30] sm:$0xff]   ;;  %v1196_v56 = vld [vmem:[%s1603_s11 + $0x28] sm:$0xff]  }
 0x1d3   :  { %v355_v58 = vpop.f32.mrf.mxu1 }
 0x1d4   :  { %1210 = vpow2.f32 %v927_v57  ;;  %v356_v59 = vadd.f32 %v918_v53, %v355_v58  ;;  %v1197_v57 = vld [vmem:[%s1603_s11 + $0x20] sm:$0xff]   ;;  %v1198_v58 = vld [vmem:[%s1603_s11 + $0x18] sm:$0xff]  }
 0x1d5   :  { %v1057_v60 = vpop.f32.mrf.mxu1 }
 0x1d6   :  { %v928_v61 = vmul.f32 -1.442695, %v356_v59  ;;  %v1199_v59 = vld [vmem:[%s1603_s11 + $0x10] sm:$0xff]   ;;  %v1200_v60 = vld [vmem:[%s1603_s11 + $0x8] sm:$0xff]  }
 0x1d8   :  { %1212 = vpow2.f32 %v928_v61  ;;  %v1201_v61 = vld [vmem:[%s1603_s11] sm:$0xff]  }
 0x1e1   :  { %v1211_v62 = vpop.eup %1210 }
 0x1e2   :  { %v365_v63 = vadd.f32 1.0, %v1211_v62  ;;  %v951_v62 = vld [vmem:[%s1602_s10] ss:$0 sm:$0xff] }
 0x1e4   :  { %1214 = vrcp.f32 %v365_v63 }
 0x1e5   :  { %v1213_v0 = vpop.eup %1212 }
 0x1e6   :  { %v366_v1 = vadd.f32 1.0, %v1213_v0 }
 0x1e8   :  { %1216 = vrcp.f32 %v366_v1 }
 0x1f1   :  { %v1215_v2 = vpop.eup %1214 }
 0x1f5   :  { %v1217_v3 = vpop.eup %1216 }
 0x1f6   :  { %v371_v4 = vpack.c.bf16 %v1217_v3, %v1215_v2 }
 0x1f8   :  { %1075 = vmatmul.mubr.bf16.vlgmr.msra.gmra.mxu0 %v371_v4 }
 0x1f9   :  { %1114 = vmatprep.mubr.msk.bf16.mxu0 %vm1273_vm0, %v1272_v19  ;;  %1099 = vmatpush3.bf16.msra.mxu0 %v1186_v30 }
 0x1fa   :  { %1100 = vmatprep.subr.bf16.mxu0 %v1272_v19 }
 0x1fd   :  { %1101 = vmatpush3.bf16.msra.mxu0 %v1187_v31 }
 0x1fe   :  { %1102 = vmatprep.subr.bf16.mxu0 %v1272_v19 }
 0x201   :  { %1103 = vmatpush3.bf16.msra.mxu0 %v1188_v32 }
 0x202   :  { %1104 = vmatprep.subr.bf16.mxu0 %v1272_v19 }
 0x205   :  { %1105 = vmatpush3.bf16.msra.mxu0 %v1189_v33 }
 0x206   :  { %1106 = vmatprep.subr.bf16.mxu0 %v1272_v19 }
 0x209   :  { %1107 = vmatpush3.bf16.msra.mxu0 %v1190_v34 }
 0x20a   :  { %1108 = vmatprep.subr.bf16.mxu0 %v1272_v19 }
 0x20d   :  { %1109 = vmatpush3.bf16.msra.mxu0 %v1191_v35 }
 0x20e   :  { %1110 = vmatprep.subr.bf16.mxu0 %v1272_v19 }
 0x211   :  { %1111 = vmatpush3.bf16.msra.mxu0 %v1192_v36 }
 0x212   :  { %1112 = vmatprep.subr.bf16.mxu0 %v1272_v19 }
 0x215   :  { %1113 = vmatpush3.bf16.msra.mxu0 %v1193_v37 }
 0x2b8   :  { %v477_v14 = vpop.f32.mrf.mxu0 }
 0x2b9   :  { %v478_v15 = vadd.f32 %v929_v13, %v477_v14 }
 0x2ba   :  { %v1076_v16 = vpop.f32.mrf.mxu0 }
 0x2bb   :  { %v938_v17 = vmul.f32 -1.442695, %v478_v15 }
 0x2bc   :  { %v480_v18 = vpop.f32.mrf.mxu0 }
 0x2bd   :  { %1218 = vpow2.f32 %v938_v17  ;;  %v481_v20 = vadd.f32 %v929_v13, %v480_v18  ;;  %v962_v13 = vld [vmem:[%s1604_s12] ss:$0 sm:$0xff]  ;;  %s1274_s12 = smov [#allocation2]  }
 0x2be   :  { %v1077_v21 = vpop.f32.mrf.mxu0  ;;  %s886_s23 = sshll.u32 %s1274_s12, 4  ;;  %s887_s23 = int_to_ptr.vmem [resolvable:$true] %s886_s23 }
 0x2bf   :  { %v939_v22 = vmul.f32 -1.442695, %v481_v20  ;;  %s1250_s24 = scalar_lea.vmem %s887_s23, 256  ;;  %p1255_p1 = scmp.lt.s32.totalorder %s887_s23, %s887_s23 }
 0x2c0   :  { %p1251_p0 = scmp.ne.s32.totalorder %s887_s23, %s1250_s24  ;;  %p1256_p2 = scmp.lt.s32.totalorder %s1250_s24, %s1250_s24 }
 0x2c1   :  { %1220 = vpow2.f32 %v939_v22 }
 0x2c2   :  { %p1257_p3 = por %p1256_p2, %p1255_p1 }
 0x2c4   :  { %p1258_p4 = pnand %p1257_p3, %p1251_p0 }
 0x2ca   :  { %v1219_v23 = vpop.eup %1218 }
 0x2cb   :  { %v490_v24 = vadd.f32 1.0, %v1219_v23 }
 0x2cd   :  { %1222 = vrcp.f32 %v490_v24 }
 0x2ce   :  { %v1221_v25 = vpop.eup %1220 }
 0x2cf   :  { %v491_v26 = vadd.f32 1.0, %v1221_v25 }
 0x2d1   :  { %1224 = vrcp.f32 %v491_v26 }
 0x2da   :  { %v1223_v27 = vpop.eup %1222 }
 0x2de   :  { %v1225_v28 = vpop.eup %1224 }
 0x2df   :  { %v496_v29 = vpack.c.bf16 %v1225_v28, %v1223_v27 }
 0x2e1   :  { %1095 = vmatmul.mubr.bf16.vlgmr.msra.gmra.mxu1 %v496_v29 }
 0x2e2   :  { %1134 = vmatprep.mubr.msk.bf16.mxu1 %vm1273_vm0, %v1272_v19  ;;  %1119 = vmatpush3.bf16.msra.mxu1 %v1194_v54 }
 0x2e3   :  { %1120 = vmatprep.subr.bf16.mxu1 %v1272_v19 }
 0x2e6   :  { %1121 = vmatpush3.bf16.msra.mxu1 %v1195_v55 }
 0x2e7   :  { %1122 = vmatprep.subr.bf16.mxu1 %v1272_v19 }
 0x2ea   :  { %1123 = vmatpush3.bf16.msra.mxu1 %v1196_v56 }
 0x2eb   :  { %1124 = vmatprep.subr.bf16.mxu1 %v1272_v19 }
 0x2ee   :  { %1125 = vmatpush3.bf16.msra.mxu1 %v1197_v57 }
 0x2ef   :  { %1126 = vmatprep.subr.bf16.mxu1 %v1272_v19 }
 0x2f2   :  { %1127 = vmatpush3.bf16.msra.mxu1 %v1198_v58 }
 0x2f3   :  { %1128 = vmatprep.subr.bf16.mxu1 %v1272_v19 }
 0x2f6   :  { %1129 = vmatpush3.bf16.msra.mxu1 %v1199_v59 }
 0x2f7   :  { %1130 = vmatprep.subr.bf16.mxu1 %v1272_v19 }
 0x2fa   :  { %1131 = vmatpush3.bf16.msra.mxu1 %v1200_v60 }
 0x2fb   :  { %1132 = vmatprep.subr.bf16.mxu1 %v1272_v19 }
 0x2fe   :  { %1133 = vmatpush3.bf16.msra.mxu1 %v1201_v61 }
 0x3a1   :  { %v602_v39 = vpop.f32.mrf.mxu1 }
 0x3a2   :  { %v603_v40 = vadd.f32 %v940_v38, %v602_v39 }
 0x3a3   :  { %v1096_v41 = vpop.f32.mrf.mxu1 }
 0x3a4   :  { %v949_v42 = vmul.f32 -1.442695, %v603_v40 }
 0x3a5   :  { %v605_v43 = vpop.f32.mrf.mxu1 }
 0x3a6   :  { %1226 = vpow2.f32 %v949_v42  ;;  %v606_v44 = vadd.f32 %v940_v38, %v605_v43 }
 0x3a7   :  { %v1097_v45 = vpop.f32.mrf.mxu1 }
 0x3a8   :  { %v950_v46 = vmul.f32 -1.442695, %v606_v44 }
 0x3aa   :  { %1228 = vpow2.f32 %v950_v46 }
 0x3b3   :  { %v1227_v47 = vpop.eup %1226 }
 0x3b4   :  { %v615_v48 = vadd.f32 1.0, %v1227_v47 }
 0x3b6   :  { %1230 = vrcp.f32 %v615_v48 }
 0x3b7   :  { %v1229_v49 = vpop.eup %1228 }
 0x3b8   :  { %v616_v50 = vadd.f32 1.0, %v1229_v49 }
 0x3ba   :  { %1232 = vrcp.f32 %v616_v50 }
 0x3c3   :  { %v1231_v51 = vpop.eup %1230 }
 0x3c7   :  { %v1233_v52 = vpop.eup %1232 }
 0x3c8   :  { %v621_v53 = vpack.c.bf16 %v1233_v52, %v1231_v51 }
 0x3ca   :  { %1115 = vmatmul.mubr.bf16.vlgmr.msra.gmra.mxu0 %v621_v53 }
 0x48a   :  { %v727_v63 = vpop.f32.mrf.mxu0 }
 0x48b   :  { %v728_v0 = vadd.f32 %v951_v62, %v727_v63 }
 0x48c   :  { %v1116_v1 = vpop.f32.mrf.mxu0 }
 0x48d   :  { %v960_v2 = vmul.f32 -1.442695, %v728_v0 }
 0x48e   :  { %v730_v3 = vpop.f32.mrf.mxu0 }
 0x48f   :  { %1234 = vpow2.f32 %v960_v2  ;;  %v731_v4 = vadd.f32 %v951_v62, %v730_v3 }
 0x490   :  { %v1117_v5 = vpop.f32.mrf.mxu0 }
 0x491   :  { %v961_v6 = vmul.f32 -1.442695, %v731_v4 }
 0x493   :  { %1236 = vpow2.f32 %v961_v6 }
 0x49c   :  { %v1235_v7 = vpop.eup %1234 }
 0x49d   :  { %v740_v8 = vadd.f32 1.0, %v1235_v7 }
 0x49f   :  { %1238 = vrcp.f32 %v740_v8 }
 0x4a0   :  { %v1237_v9 = vpop.eup %1236 }
 0x4a1   :  { %v741_v10 = vadd.f32 1.0, %v1237_v9 }
 0x4a3   :  { %1240 = vrcp.f32 %v741_v10 }
 0x4ac   :  { %v1239_v19 = vpop.eup %1238 }
 0x4b0   :  { %v1241_v11 = vpop.eup %1240 }
 0x4b1   :  { %v746_v12 = vpack.c.bf16 %v1241_v11, %v1239_v19 }
 0x4b3   :  { %1135 = vmatmul.mubr.bf16.vlgmr.msra.gmra.mxu1 %v746_v12 }
 0x573   :  { %v852_v14 = vpop.f32.mrf.mxu1 }
 0x574   :  { %v853_v15 = vadd.f32 %v962_v13, %v852_v14 }
 0x575   :  { %v1136_v16 = vpop.f32.mrf.mxu1 }
 0x576   :  { %859 = vmax.xlane.f32.xlu0 %v853_v15 }
 0x577   :  { %v855_v17 = vpop.f32.mrf.mxu1 }
 0x578   :  { %v856_v18 = vadd.f32 %v962_v13, %v855_v17 }
 0x579   :  { %v1137_v20 = vpop.f32.mrf.mxu1 }
 0x57a   :  { %861 = vmax.xlane.f32.xlu0 %v856_v18 }
 0x5ff   :  { %v860_v21 = vpop.xlane.xlu0 %859 }
 0x600   :  { %v863_v22 = vsub.f32 %v853_v15, %v860_v21 }
 0x602   :  { %v865_v23 = vmul.f32 1.442695, %v863_v22 }
 0x603   :  { %v862_v24 = vpop.xlane.xlu0 %861 }
 0x604   :  { %v864_v25 = vsub.f32 %v856_v18, %v862_v24  ;;  %1242 = vpow2.f32 %v865_v23 }
 0x606   :  { %v867_v26 = vmul.f32 1.442695, %v864_v25 }
 0x608   :  { %1244 = vpow2.f32 %v867_v26 }
 0x611   :  { %v1243_v27 = vpop.eup %1242 }
 0x612   :  { %869 = vadd.xlane.f32.xlu1 %v1243_v27 }
 0x615   :  { %v1245_v28 = vpop.eup %1244 }
 0x616   :  { %871 = vadd.xlane.f32.xlu1 %v1245_v28 }
 0x69b   :  { %v870_v29 = vpop.xlane.xlu1 %869 }
 0x69c   :  { %1246 = vlog2.f32 %v870_v29 }
 0x69f   :  { %v872_v30 = vpop.xlane.xlu1 %871 }
 0x6a0   :  { %1248 = vlog2.f32 %v872_v30 }
 0x6a9   :  { %v1247_v31 = vpop.eup %1246 }
 0x6aa   :  { %v874_v32 = vmul.f32 0.6931472, %v1247_v31 }
 0x6ac   :  { %v877_v33 = vsub.f32 %v863_v22, %v874_v32 }
 0x6ad   :  { %v1249_v34 = vpop.eup %1248 }
 0x6ae   :  { %879 = vst [vmem:[#allocation2] sm:$0xff] %v877_v33  ;;  %v876_v35 = vmul.f32 0.6931472, %v1249_v34 }
 0x6b0   :  { %v878_v36 = vsub.f32 %v864_v25, %v876_v35 }
 0x6b2   :  { %880 = vst [vmem:[#allocation2 + $0x8] sm:$0xff] %v878_v36 }
 0x6b3   :  { %1261 = shalt.err (!%p1258_p4)
}
 0x6b4   :  { %s1275_s25 = smov 128   ;;  %s1276_s2 = smov 8  }
 0x6b5   :  { %892 = dma.vmem_to_hbm [thread:$0]  %s887_s23, 256, %s1605_s13, [#allocation3], %s1275_s25, %s1275_s25, %s1276_s2  }
 0x6b6   :  { %1270 = dma.done.wait [#allocation3], 256  }
 0x6b7   :  { %1271 = vsyncadd [#allocation3], 4294967040 }
 0x6b8   :  { %896 = vsyncpa [#allocation3], 1 }

</bundles_post_ra>
